<compile_context>
chip_gen: v7x
topology: tpu7x:2x2x1
jax: 0.10.0
libtpu: 0.0.40
codegen_flags: <defaults>
</compile_context>

<pallas_src>
import functools

import jax
import jax.numpy as jnp
from jax import lax
from jax.experimental import pallas as pl
from jax.experimental.pallas import tpu as pltpu


# ----------------------------- Pallas kernel ------------------------------ #

def _ocr_kernel(x_ref, p_ref,
                w1p_ref, w1od_ref, w2_ref, wu_ref, wf_ref,
                bk_ref, bu_ref, bf_ref,
                o_ref,
                k_scr, v_scr, *, key_channels):
    K = key_channels
    f32 = jnp.float32
    bf16 = jnp.bfloat16

    # ---- per-batch prologue: key / value from the proxy (cached in VMEM) ----
    @pl.when(pl.program_id(1) == 0)
    def _():
        p = p_ref[...]                                               # (Cin, M) bf16
        # f_object stage 1 and f_down as one wide matmul: (2K, Cin) @ (Cin, M)
        kv1 = jnp.dot(w1od_ref[...], p, preferred_element_type=f32)  # (2K, M)
        k1 = jnp.maximum(kv1[:K] + bk_ref[2], 0.0)                   # f_object s1
        v = jnp.maximum(kv1[K:] + bk_ref[4], 0.0)                    # f_down
        k2 = jnp.dot(w2_ref[1], k1.astype(bf16), preferred_element_type=f32)
        k2 = jnp.maximum(k2 + bk_ref[3], 0.0)                        # f_object s2
        k_scr[...] = k2.astype(bf16)                                 # (K, M)
        v_scr[...] = v.astype(bf16)                                  # (K, M)

    # ---- query projection (f_pixel) for this N-tile ----
    x = x_ref[...]                                                   # (Cin, TN) bf16
    q1 = jnp.dot(w1p_ref[...], x, preferred_element_type=f32)        # (K, TN)
    q1 = jnp.maximum(q1 + bk_ref[0], 0.0)
    q2 = jnp.dot(w2_ref[0], q1.astype(bf16), preferred_element_type=f32)
    q2 = jnp.maximum(q2 + bk_ref[1], 0.0)          # 1/sqrt(K) scale pre-folded
    qb = q2.astype(bf16)                                             # (K, TN)

    # ---- attention: sim(M, TN) = k^T q ; softmax over the proxy dim M ----
    sim = lax.dot_general(k_scr[...], qb,
                          dimension_numbers=(((0,), (0,)), ((), ())),
                          preferred_element_type=f32)                # (M, TN)
    sim = sim - jnp.max(sim, axis=0, keepdims=True)
    e = jnp.exp(sim)
    inv = pl.reciprocal(jnp.sum(e, axis=0, keepdims=True), approx=True)
    sm = e * inv                                                     # (M, TN) f32
    ctx = jnp.dot(v_scr[...], sm.astype(bf16),
                  preferred_element_type=f32)                        # (K, TN)

    # ---- f_up ----
    up = jnp.dot(wu_ref[...], ctx.astype(bf16), preferred_element_type=f32)
    up = jnp.maximum(up + bu_ref[...], 0.0)                          # (Cin, TN)

    # ---- conv_bn_dropout(cat([context, feats], C)) == sum of two matmuls ----
    out = (jnp.dot(wf_ref[0], up.astype(bf16), preferred_element_type=f32)
           + jnp.dot(wf_ref[1], x, preferred_element_type=f32)
           + bf_ref[...])
    o_ref[...] = jnp.maximum(out, 0.0)   # ReLU; Dropout2d is identity (eval)


# ------------------------------ host wrapper ------------------------------ #

def _fold_conv_bn(key, cin, cout, eps=1e-5):
    """Deterministic synthetic conv(1x1, no bias) + BatchNorm(eval) folding.

    Returns (W, b) with W of shape (cout, cin) so that y = W @ x + b[:, None].
    """
    kw, kg, kb, km, kv = jax.random.split(key, 5)
    w = jax.random.normal(kw, (cout, cin), jnp.float32) / jnp.sqrt(cin)
    gamma = 1.0 + 0.1 * jax.random.normal(kg, (cout,), jnp.float32)
    beta = 0.1 * jax.random.normal(kb, (cout,), jnp.float32)
    mean = 0.1 * jax.random.normal(km, (cout,), jnp.float32)
    var = jnp.abs(jax.random.normal(kv, (cout,), jnp.float32)) + 0.5
    s = gamma / jnp.sqrt(var + eps)
    return w * s[:, None], beta - mean * s


def make_spatial_ocr_params(key, in_channels, key_channels, out_channels):
    ks = jax.random.split(key, 7)
    p = {}
    p["w1p"], p["b1p"] = _fold_conv_bn(ks[0], in_channels, key_channels)
    p["w2p"], p["b2p"] = _fold_conv_bn(ks[1], key_channels, key_channels)
    p["w1o"], p["b1o"] = _fold_conv_bn(ks[2], in_channels, key_channels)
    p["w2o"], p["b2o"] = _fold_conv_bn(ks[3], key_channels, key_channels)
    p["wd"], p["bd"] = _fold_conv_bn(ks[4], in_channels, key_channels)
    p["wu"], p["bu"] = _fold_conv_bn(ks[5], key_channels, in_channels)
    p["wf"], p["bfv"] = _fold_conv_bn(ks[6], 2 * in_channels, out_channels)
    return p


def pack_params(params, in_channels, key_channels):
    """Pack logical (conv+BN-folded) parameters for the kernel.

    Exact algebraic refactorings only:
      - attention scale folded into w2p/b2p (scale > 0 commutes with ReLU),
      - f_object-stage1 / f_down weights stacked -> one wide matmul,
      - final (Cout, 2Cin) conv split into a (2, Cout, Cin) stack so the
        channel concat becomes a sum of two matmuls.
    Weights are cast to bf16 (MXU input precision); biases stay f32 columns.
    """
    bf16 = jnp.bfloat16
    scale = key_channels ** (-0.5)
    wf = params["wf"]
    return {
        "w1p": params["w1p"].astype(bf16),                                    # (K, Cin)
        "w1od": jnp.concatenate([params["w1o"], params["wd"]], 0).astype(bf16),  # (2K, Cin)
        "w2": jnp.stack([params["w2p"] * scale, params["w2o"]], 0).astype(bf16),  # (2, K, K)
        "wu": params["wu"].astype(bf16),                                      # (Cin, K)
        "wf": jnp.stack([wf[:, :in_channels], wf[:, in_channels:]], 0).astype(bf16),  # (2, Cout, Cin)
        "bk": jnp.stack([params["b1p"], params["b2p"] * scale, params["b1o"],
                         params["b2o"], params["bd"]], 0)[:, :, None],        # (5, K, 1) f32
        "bu": params["bu"][:, None],                                          # (Cin, 1) f32
        "bf": params["bfv"][:, None],                                         # (Cout, 1) f32
    }


def _pick_tile_n(n, max_tile=512):
    """Largest multiple-of-128 divisor of n that is <= max_tile; else full n."""
    if n % 128 != 0 or n <= max_tile:
        return n
    t = (max_tile // 128) * 128
    while t >= 128:
        if n % t == 0:
            return t
        t -= 128
    return n


def _whole_spec(shape):
    rank = len(shape)
    return pl.BlockSpec(shape, lambda b, j, _r=rank: (0,) * _r)


def spatial_ocr_forward(feats, proxy_feats, packed, key_channels, *,
                        tile_n=512, vmem_limit_bytes=48 * 1024 * 1024):
    """feats: (B, Cin, H, W), proxy_feats: (B, Cin, Hp, Wp) — NCHW like torch."""
    B, Cin, H, W = feats.shape
    _, _, Hp, Wp = proxy_feats.shape
    N, M = H * W, Hp * Wp
    Cout = packed["bf"].shape[0]

    TN = _pick_tile_n(N, tile_n)
    NT = N // TN

    # Channels-first token form: pure reshape, no transpose, bf16 for HBM/MXU.
    x = feats.reshape(B, Cin, N).astype(jnp.bfloat16)
    p = proxy_feats.reshape(B, Cin, M).astype(jnp.bfloat16)

    in_specs = [
        pl.BlockSpec((None, Cin, TN), lambda b, j: (b, 0, j)),   # x: streamed N-tiles
        pl.BlockSpec((None, Cin, M), lambda b, j: (b, 0, 0)),    # proxy: fetched once/batch
        _whole_spec(packed["w1p"].shape), _whole_spec(packed["w1od"].shape),
        _whole_spec(packed["w2"].shape), _whole_spec(packed["wu"].shape),
        _whole_spec(packed["wf"].shape), _whole_spec(packed["bk"].shape),
        _whole_spec(packed["bu"].shape), _whole_spec(packed["bf"].shape),
    ]

    out = pl.pallas_call(
        functools.partial(_ocr_kernel, key_channels=key_channels),
        out_shape=jax.ShapeDtypeStruct((B, Cout, N), jnp.float32),
        grid_spec=pltpu.PrefetchScalarGridSpec(
            num_scalar_prefetch=0,
            grid=(B, NT),
            in_specs=in_specs,
            out_specs=pl.BlockSpec((None, Cout, TN), lambda b, j: (b, 0, j)),
            scratch_shapes=[pltpu.VMEM((key_channels, M), jnp.bfloat16),   # key cache
                            pltpu.VMEM((key_channels, M), jnp.bfloat16)],  # value cache
        ),
        compiler_params=pltpu.CompilerParams(
            # N-tile axis carries the k/v scratch -> must be "arbitrary".
            dimension_semantics=("parallel", "arbitrary"),
            vmem_limit_bytes=vmem_limit_bytes,
        ),
    )(x, p, packed["w1p"], packed["w1od"], packed["w2"], packed["wu"],
      packed["wf"], packed["bk"], packed["bu"], packed["bf"])

    return out.reshape(B, Cout, H, W)


# --------------------------- pure-JAX reference ---------------------------- #

def spatial_ocr_reference(feats, proxy_feats, packed, key_channels):
    """Faithful SpatialOCR forward in plain JAX, using the same folded weights
    and the same bf16-matmul / f32-accumulate precision as the kernel."""
    B, Cin, H, W = feats.shape
    _, _, Hp, Wp = proxy_feats.shape
    N, M = H * W, Hp * Wp
    K = key_channels
    bf16 = jnp.bfloat16

    x = feats.reshape(B, Cin, N).astype(bf16)
    p = proxy_feats.reshape(B, Cin, M).astype(bf16)

    def mm(w, a):   # (o, i) @ (B, i, n) -> (B, o, n), bf16 in / f32 accumulate
        return jnp.einsum("oi,bin->bon", w.astype(bf16), a.astype(bf16),
                          preferred_element_type=jnp.float32)

    relu = lambda z: jnp.maximum(z, 0.0)
    # f_pixel (query)
    q = relu(mm(packed["w1p"], x) + packed["bk"][0])
    q = relu(mm(packed["w2"][0], q) + packed["bk"][1])       # scale pre-folded
    # f_object (key)
    k = relu(mm(packed["w1od"][:K], p) + packed["bk"][2])
    k = relu(mm(packed["w2"][1], k) + packed["bk"][3])
    # f_down (value)
    v = relu(mm(packed["w1od"][K:], p) + packed["bk"][4])
    # scaled dot-product attention (scale already inside q), softmax over M
    sim = jnp.einsum("bkm,bkn->bmn", k.astype(bf16), q.astype(bf16),
                     preferred_element_type=jnp.float32)     # (B, M, N)
    sm = jax.nn.softmax(sim, axis=1)
    ctx = jnp.einsum("bkm,bmn->bkn", v.astype(bf16), sm.astype(bf16),
                     preferred_element_type=jnp.float32)     # (B, K, N)
    # f_up
    up = relu(mm(packed["wu"], ctx) + packed["bu"])          # (B, Cin, N)
    # conv_bn_dropout over channel concat([context, feats])
    cat = jnp.concatenate([up, x.astype(jnp.float32)], axis=1)        # (B, 2Cin, N)
    wf_full = jnp.concatenate([packed["wf"][0], packed["wf"][1]], 1)  # (Cout, 2Cin)
    out = relu(mm(wf_full, cat) + packed["bf"])
    Cout = packed["bf"].shape[0]
    return out.reshape(B, Cout, H, W)


# ---------------------------------- main ----------------------------------- #

if __name__ == "__main__":
    key = jax.random.PRNGKey(0)
    k_feats, k_proxy, k_params = jax.random.split(key, 3)

    B, Cin, H, W = 2, 16, 16, 16      # feats NCHW; N = 256 -> two 128-token tiles
    Hp, Wp = 16, 1                    # proxy object regions; M = 16
    key_channels, out_channels = 8, 16

    feats = jax.random.normal(k_feats, (B, Cin, H, W), jnp.float32)
    proxy = jax.random.normal(k_proxy, (B, Cin, Hp, Wp), jnp.float32)
    params = make_spatial_ocr_params(k_params, Cin, key_channels, out_channels)
    packed = pack_params(params, Cin, key_channels)

    out = spatial_ocr_forward(feats, proxy, packed, key_channels, tile_n=128)
    out = jax.block_until_ready(out)

    ref = spatial_ocr_reference(feats, proxy, packed, key_channels)
    assert out.shape == (B, out_channels, H, W)
    assert jnp.allclose(out, ref, atol=1e-2, rtol=1e-2), \
        float(jnp.max(jnp.abs(out - ref)))

    print("KERNEL_OK")
</pallas_src>

<mosaic_0001>
module attributes {stable_mosaic.version = 11 : i64} {
  func.func @_ocr_kernel(%arg0: i32, %arg1: i32, %arg2: memref<1x16x128xbf16, #tpu.memory_space<vmem>>, %arg3: memref<1x16x16xbf16, #tpu.memory_space<vmem>>, %arg4: memref<8x16xbf16, #tpu.memory_space<vmem>>, %arg5: memref<16x16xbf16, #tpu.memory_space<vmem>>, %arg6: memref<2x8x8xbf16, #tpu.memory_space<vmem>>, %arg7: memref<16x8xbf16, #tpu.memory_space<vmem>>, %arg8: memref<2x16x16xbf16, #tpu.memory_space<vmem>>, %arg9: memref<5x8x1xf32, #tpu.memory_space<vmem>>, %arg10: memref<16x1xf32, #tpu.memory_space<vmem>>, %arg11: memref<16x1xf32, #tpu.memory_space<vmem>>, %arg12: memref<1x16x128xf32, #tpu.memory_space<vmem>>, %arg13: memref<8x16xbf16, #tpu.memory_space<vmem>>, %arg14: memref<8x16xbf16, #tpu.memory_space<vmem>>) attributes {dimension_semantics = [#tpu.dimension_semantics<parallel>, #tpu.dimension_semantics<arbitrary>], iteration_bounds = array<i64: 2, 2>, scalar_prefetch = 0 : i64, scratch_operands = 2 : i64, tpu.core_type = #tpu.core_type<tc>, window_params = [{transform_indices = @transform_0, window_bounds = array<i64: 1, 16, 128>}, {transform_indices = @transform_1, window_bounds = array<i64: 1, 16, 16>}, {pipeline_mode = #tpu.pipeline_mode<synchronous>, transform_indices = @transform_2, window_bounds = array<i64: 8, 16>}, {pipeline_mode = #tpu.pipeline_mode<synchronous>, transform_indices = @transform_3, window_bounds = array<i64: 16, 16>}, {pipeline_mode = #tpu.pipeline_mode<synchronous>, transform_indices = @transform_4, window_bounds = array<i64: 2, 8, 8>}, {pipeline_mode = #tpu.pipeline_mode<synchronous>, transform_indices = @transform_5, window_bounds = array<i64: 16, 8>}, {pipeline_mode = #tpu.pipeline_mode<synchronous>, transform_indices = @transform_6, window_bounds = array<i64: 2, 16, 16>}, {pipeline_mode = #tpu.pipeline_mode<synchronous>, transform_indices = @transform_7, window_bounds = array<i64: 5, 8, 1>}, {pipeline_mode = #tpu.pipeline_mode<synchronous>, transform_indices = @transform_8, window_bounds = array<i64: 16, 1>}, {pipeline_mode = #tpu.pipeline_mode<synchronous>, transform_indices = @transform_9, window_bounds = array<i64: 16, 1>}, {transform_indices = @transform_10, window_bounds = array<i64: 1, 16, 128>}]} {
    %c0_i32 = arith.constant 0 : i32
    %0 = arith.cmpi eq, %arg1, %c0_i32 : i32
    %1 = arith.extui %0 : i1 to i32
    %c0_i32_0 = arith.constant 0 : i32
    %2 = arith.cmpi ne, %1, %c0_i32_0 : i32
    scf.if %2 {
      %c0_44 = arith.constant 0 : index
      %c0_45 = arith.constant 0 : index
      %c0_46 = arith.constant 0 : index
      %63 = vector.load %arg3[%c0_44, %c0_45, %c0_46] : memref<1x16x16xbf16, #tpu.memory_space<vmem>>, vector<1x16x16xbf16>
      %64 = vector.shape_cast %63 : vector<1x16x16xbf16> to vector<16x16xbf16>
      %c0_47 = arith.constant 0 : index
      %c0_48 = arith.constant 0 : index
      %65 = vector.load %arg5[%c0_47, %c0_48] : memref<16x16xbf16, #tpu.memory_space<vmem>>, vector<16x16xbf16>
      %cst_49 = arith.constant dense<0.000000e+00> : vector<16x16xf32>
      %66 = tpu.matmul %65, %64, %cst_49 {dimension_numbers = #tpu.dot_dimension_numbers<[1], [0], [0], [1], [0, 0, 1, 1], [], []>} : vector<16x16xbf16>, vector<16x16xbf16>, vector<16x16xf32> -> vector<16x16xf32>
      %67 = vector.extract_strided_slice %66 {offsets = [0, 0], sizes = [8, 16], strides = [1, 1]} : vector<16x16xf32> to vector<8x16xf32>
      %c2 = arith.constant 2 : index
      %c0_50 = arith.constant 0 : index
      %c0_51 = arith.constant 0 : index
      %68 = vector.load %arg9[%c2, %c0_50, %c0_51] : memref<5x8x1xf32, #tpu.memory_space<vmem>>, vector<1x8x1xf32>
      %69 = vector.shape_cast %68 : vector<1x8x1xf32> to vector<8x1xf32>
      %70 = vector.broadcast %69 : vector<8x1xf32> to vector<8x16xf32>
      %71 = arith.addf %67, %70 : vector<8x16xf32>
      %cst_52 = arith.constant 0.000000e+00 : f32
      %72 = vector.broadcast %cst_52 : f32 to vector<8x16xf32>
      %73 = arith.maximumf %71, %72 : vector<8x16xf32>
      %74 = vector.extract_strided_slice %66 {offsets = [8, 0], sizes = [8, 16], strides = [1, 1]} : vector<16x16xf32> to vector<8x16xf32>
      %c4 = arith.constant 4 : index
      %c0_53 = arith.constant 0 : index
      %c0_54 = arith.constant 0 : index
      %75 = vector.load %arg9[%c4, %c0_53, %c0_54] : memref<5x8x1xf32, #tpu.memory_space<vmem>>, vector<1x8x1xf32>
      %76 = vector.shape_cast %75 : vector<1x8x1xf32> to vector<8x1xf32>
      %77 = vector.broadcast %76 : vector<8x1xf32> to vector<8x16xf32>
      %78 = arith.addf %74, %77 : vector<8x16xf32>
      %cst_55 = arith.constant 0.000000e+00 : f32
      %79 = vector.broadcast %cst_55 : f32 to vector<8x16xf32>
      %80 = arith.maximumf %78, %79 : vector<8x16xf32>
      %c1_56 = arith.constant 1 : index
      %c0_57 = arith.constant 0 : index
      %c0_58 = arith.constant 0 : index
      %81 = vector.load %arg6[%c1_56, %c0_57, %c0_58] : memref<2x8x8xbf16, #tpu.memory_space<vmem>>, vector<1x8x8xbf16>
      %82 = vector.shape_cast %81 : vector<1x8x8xbf16> to vector<8x8xbf16>
      %83 = arith.truncf %73 : vector<8x16xf32> to vector<8x16xbf16>
      %cst_59 = arith.constant dense<0.000000e+00> : vector<8x16xf32>
      %84 = tpu.matmul %82, %83, %cst_59 {dimension_numbers = #tpu.dot_dimension_numbers<[1], [0], [0], [1], [0, 0, 1, 1], [], []>} : vector<8x8xbf16>, vector<8x16xbf16>, vector<8x16xf32> -> vector<8x16xf32>
      %c3 = arith.constant 3 : index
      %c0_60 = arith.constant 0 : index
      %c0_61 = arith.constant 0 : index
      %85 = vector.load %arg9[%c3, %c0_60, %c0_61] : memref<5x8x1xf32, #tpu.memory_space<vmem>>, vector<1x8x1xf32>
      %86 = vector.shape_cast %85 : vector<1x8x1xf32> to vector<8x1xf32>
      %87 = vector.broadcast %86 : vector<8x1xf32> to vector<8x16xf32>
      %88 = arith.addf %84, %87 : vector<8x16xf32>
      %cst_62 = arith.constant 0.000000e+00 : f32
      %89 = vector.broadcast %cst_62 : f32 to vector<8x16xf32>
      %90 = arith.maximumf %88, %89 : vector<8x16xf32>
      %91 = arith.truncf %90 : vector<8x16xf32> to vector<8x16xbf16>
      %c0_63 = arith.constant 0 : index
      %c0_64 = arith.constant 0 : index
      %92 = vector.load %arg13[%c0_63, %c0_64] : memref<8x16xbf16, #tpu.memory_space<vmem>>, vector<8x16xbf16>
      tpu.vector_store %arg13[%c0_63, %c0_64], %91 {strides = array<i32>} : memref<8x16xbf16, #tpu.memory_space<vmem>>, vector<8x16xbf16>,
      %93 = arith.truncf %80 : vector<8x16xf32> to vector<8x16xbf16>
      %c0_65 = arith.constant 0 : index
      %c0_66 = arith.constant 0 : index
      %94 = vector.load %arg14[%c0_65, %c0_66] : memref<8x16xbf16, #tpu.memory_space<vmem>>, vector<8x16xbf16>
      tpu.vector_store %arg14[%c0_65, %c0_66], %93 {strides = array<i32>} : memref<8x16xbf16, #tpu.memory_space<vmem>>, vector<8x16xbf16>,
    } else {
    }
    %c0 = arith.constant 0 : index
    %c0_1 = arith.constant 0 : index
    %c0_2 = arith.constant 0 : index
    %3 = vector.load %arg2[%c0, %c0_1, %c0_2] : memref<1x16x128xbf16, #tpu.memory_space<vmem>>, vector<1x16x128xbf16>
    %4 = vector.shape_cast %3 : vector<1x16x128xbf16> to vector<16x128xbf16>
    %c0_3 = arith.constant 0 : index
    %c0_4 = arith.constant 0 : index
    %5 = vector.load %arg4[%c0_3, %c0_4] : memref<8x16xbf16, #tpu.memory_space<vmem>>, vector<8x16xbf16>
    %cst = arith.constant dense<0.000000e+00> : vector<8x128xf32>
    %6 = tpu.matmul %5, %4, %cst {dimension_numbers = #tpu.dot_dimension_numbers<[1], [0], [0], [1], [0, 0, 1, 1], [], []>} : vector<8x16xbf16>, vector<16x128xbf16>, vector<8x128xf32> -> vector<8x128xf32>
    %c0_5 = arith.constant 0 : index
    %c0_6 = arith.constant 0 : index
    %c0_7 = arith.constant 0 : index
    %7 = vector.load %arg9[%c0_5, %c0_6, %c0_7] : memref<5x8x1xf32, #tpu.memory_space<vmem>>, vector<1x8x1xf32>
    %8 = vector.shape_cast %7 : vector<1x8x1xf32> to vector<8x1xf32>
    %9 = vector.broadcast %8 : vector<8x1xf32> to vector<8x128xf32>
    %10 = arith.addf %6, %9 : vector<8x128xf32>
    %cst_8 = arith.constant 0.000000e+00 : f32
    %11 = vector.broadcast %cst_8 : f32 to vector<8x128xf32>
    %12 = arith.maximumf %10, %11 : vector<8x128xf32>
    %c0_9 = arith.constant 0 : index
    %c0_10 = arith.constant 0 : index
    %c0_11 = arith.constant 0 : index
    %13 = vector.load %arg6[%c0_9, %c0_10, %c0_11] : memref<2x8x8xbf16, #tpu.memory_space<vmem>>, vector<1x8x8xbf16>
    %14 = vector.shape_cast %13 : vector<1x8x8xbf16> to vector<8x8xbf16>
    %15 = arith.truncf %12 : vector<8x128xf32> to vector<8x128xbf16>
    %cst_12 = arith.constant dense<0.000000e+00> : vector<8x128xf32>
    %16 = tpu.matmul %14, %15, %cst_12 {dimension_numbers = #tpu.dot_dimension_numbers<[1], [0], [0], [1], [0, 0, 1, 1], [], []>} : vector<8x8xbf16>, vector<8x128xbf16>, vector<8x128xf32> -> vector<8x128xf32>
    %c1 = arith.constant 1 : index
    %c0_13 = arith.constant 0 : index
    %c0_14 = arith.constant 0 : index
    %17 = vector.load %arg9[%c1, %c0_13, %c0_14] : memref<5x8x1xf32, #tpu.memory_space<vmem>>, vector<1x8x1xf32>
    %18 = vector.shape_cast %17 : vector<1x8x1xf32> to vector<8x1xf32>
    %19 = vector.broadcast %18 : vector<8x1xf32> to vector<8x128xf32>
    %20 = arith.addf %16, %19 : vector<8x128xf32>
    %cst_15 = arith.constant 0.000000e+00 : f32
    %21 = vector.broadcast %cst_15 : f32 to vector<8x128xf32>
    %22 = arith.maximumf %20, %21 : vector<8x128xf32>
    %23 = arith.truncf %22 : vector<8x128xf32> to vector<8x128xbf16>
    %c0_16 = arith.constant 0 : index
    %c0_17 = arith.constant 0 : index
    %24 = vector.load %arg13[%c0_16, %c0_17] : memref<8x16xbf16, #tpu.memory_space<vmem>>, vector<8x16xbf16>
    %cst_18 = arith.constant dense<0.000000e+00> : vector<16x128xf32>
    %25 = tpu.matmul %24, %23, %cst_18 {dimension_numbers = #tpu.dot_dimension_numbers<[0], [0], [1], [1], [0, 1, 1, 1], [], []>} : vector<8x16xbf16>, vector<8x128xbf16>, vector<16x128xf32> -> vector<16x128xf32>
    %cst_19 = arith.constant dense<0xFF800000> : vector<128xf32>
    %26 = vector.multi_reduction <maximumf>, %25, %cst_19 [0] : vector<16x128xf32> to vector<128xf32>
    %27 = vector.shape_cast %26 : vector<128xf32> to vector<1x128xf32>
    %28 = vector.broadcast %27 : vector<1x128xf32> to vector<16x128xf32>
    %29 = arith.subf %25, %28 : vector<16x128xf32>
    %30 = math.exp %29 : vector<16x128xf32>
    %cst_20 = arith.constant dense<0.000000e+00> : vector<128xf32>
    %31 = vector.multi_reduction <add>, %30, %cst_20 [0] : vector<16x128xf32> to vector<128xf32>
    %32 = vector.shape_cast %31 : vector<128xf32> to vector<1x128xf32>
    %33 = tpu.reciprocal %32 {approx = true} : vector<1x128xf32> -> vector<1x128xf32>
    %34 = vector.broadcast %33 : vector<1x128xf32> to vector<16x128xf32>
    %35 = arith.mulf %30, %34 : vector<16x128xf32>
    %c0_21 = arith.constant 0 : index
    %c0_22 = arith.constant 0 : index
    %36 = vector.load %arg14[%c0_21, %c0_22] : memref<8x16xbf16, #tpu.memory_space<vmem>>, vector<8x16xbf16>
    %37 = arith.truncf %35 : vector<16x128xf32> to vector<16x128xbf16>
    %cst_23 = arith.constant dense<0.000000e+00> : vector<8x128xf32>
    %38 = tpu.matmul %36, %37, %cst_23 {dimension_numbers = #tpu.dot_dimension_numbers<[1], [0], [0], [1], [0, 0, 1, 1], [], []>} : vector<8x16xbf16>, vector<16x128xbf16>, vector<8x128xf32> -> vector<8x128xf32>
    %c0_24 = arith.constant 0 : index
    %c0_25 = arith.constant 0 : index
    %39 = vector.load %arg7[%c0_24, %c0_25] : memref<16x8xbf16, #tpu.memory_space<vmem>>, vector<16x8xbf16>
    %40 = arith.truncf %38 : vector<8x128xf32> to vector<8x128xbf16>
    %cst_26 = arith.constant dense<0.000000e+00> : vector<16x128xf32>
    %41 = tpu.matmul %39, %40, %cst_26 {dimension_numbers = #tpu.dot_dimension_numbers<[1], [0], [0], [1], [0, 0, 1, 1], [], []>} : vector<16x8xbf16>, vector<8x128xbf16>, vector<16x128xf32> -> vector<16x128xf32>
    %c0_27 = arith.constant 0 : index
    %c0_28 = arith.constant 0 : index
    %42 = vector.load %arg10[%c0_27, %c0_28] : memref<16x1xf32, #tpu.memory_space<vmem>>, vector<16x1xf32>
    %43 = vector.broadcast %42 : vector<16x1xf32> to vector<16x128xf32>
    %44 = arith.addf %41, %43 : vector<16x128xf32>
    %cst_29 = arith.constant 0.000000e+00 : f32
    %45 = vector.broadcast %cst_29 : f32 to vector<16x128xf32>
    %46 = arith.maximumf %44, %45 : vector<16x128xf32>
    %c0_30 = arith.constant 0 : index
    %c0_31 = arith.constant 0 : index
    %c0_32 = arith.constant 0 : index
    %47 = vector.load %arg8[%c0_30, %c0_31, %c0_32] : memref<2x16x16xbf16, #tpu.memory_space<vmem>>, vector<1x16x16xbf16>
    %48 = vector.shape_cast %47 : vector<1x16x16xbf16> to vector<16x16xbf16>
    %49 = arith.truncf %46 : vector<16x128xf32> to vector<16x128xbf16>
    %cst_33 = arith.constant dense<0.000000e+00> : vector<16x128xf32>
    %50 = tpu.matmul %48, %49, %cst_33 {dimension_numbers = #tpu.dot_dimension_numbers<[1], [0], [0], [1], [0, 0, 1, 1], [], []>} : vector<16x16xbf16>, vector<16x128xbf16>, vector<16x128xf32> -> vector<16x128xf32>
    %c1_34 = arith.constant 1 : index
    %c0_35 = arith.constant 0 : index
    %c0_36 = arith.constant 0 : index
    %51 = vector.load %arg8[%c1_34, %c0_35, %c0_36] : memref<2x16x16xbf16, #tpu.memory_space<vmem>>, vector<1x16x16xbf16>
    %52 = vector.shape_cast %51 : vector<1x16x16xbf16> to vector<16x16xbf16>
    %cst_37 = arith.constant dense<0.000000e+00> : vector<16x128xf32>
    %53 = tpu.matmul %52, %4, %cst_37 {dimension_numbers = #tpu.dot_dimension_numbers<[1], [0], [0], [1], [0, 0, 1, 1], [], []>} : vector<16x16xbf16>, vector<16x128xbf16>, vector<16x128xf32> -> vector<16x128xf32>
    %54 = arith.addf %50, %53 : vector<16x128xf32>
    %c0_38 = arith.constant 0 : index
    %c0_39 = arith.constant 0 : index
    %55 = vector.load %arg11[%c0_38, %c0_39] : memref<16x1xf32, #tpu.memory_space<vmem>>, vector<16x1xf32>
    %56 = vector.broadcast %55 : vector<16x1xf32> to vector<16x128xf32>
    %57 = arith.addf %54, %56 : vector<16x128xf32>
    %cst_40 = arith.constant 0.000000e+00 : f32
    %58 = vector.broadcast %cst_40 : f32 to vector<16x128xf32>
    %59 = arith.maximumf %57, %58 : vector<16x128xf32>
    %c0_41 = arith.constant 0 : index
    %c0_42 = arith.constant 0 : index
    %c0_43 = arith.constant 0 : index
    %60 = vector.load %arg12[%c0_41, %c0_42, %c0_43] : memref<1x16x128xf32, #tpu.memory_space<vmem>>, vector<1x16x128xf32>
    %61 = vector.shape_cast %60 : vector<1x16x128xf32> to vector<16x128xf32>
    %62 = vector.shape_cast %59 : vector<16x128xf32> to vector<1x16x128xf32>
    tpu.vector_store %arg12[%c0_41, %c0_42, %c0_43], %62 {strides = array<i32>} : memref<1x16x128xf32, #tpu.memory_space<vmem>>, vector<1x16x128xf32>,
    return
  }
  func.func @transform_0(%arg0: i32, %arg1: i32) -> (i32, i32, i32) {
    %c0_i32 = arith.constant 0 : i32
    %c0_i32_0 = arith.constant 0 : i32
    return %arg0, %c0_i32, %arg1 : i32, i32, i32
  }
  func.func @transform_1(%arg0: i32, %arg1: i32) -> (i32, i32, i32) {
    %c0_i32 = arith.constant 0 : i32
    %c0_i32_0 = arith.constant 0 : i32
    %c0_i32_1 = arith.constant 0 : i32
    return %arg0, %c0_i32, %c0_i32_0 : i32, i32, i32
  }
  func.func @transform_2(%arg0: i32, %arg1: i32) -> (i32, i32) {
    %c0_i32 = arith.constant 0 : i32
    %c0_i32_0 = arith.constant 0 : i32
    %c0_i32_1 = arith.constant 0 : i32
    return %c0_i32, %c0_i32_0 : i32, i32
  }
  func.func @transform_3(%arg0: i32, %arg1: i32) -> (i32, i32) {
    %c0_i32 = arith.constant 0 : i32
    %c0_i32_0 = arith.constant 0 : i32
    %c0_i32_1 = arith.constant 0 : i32
    return %c0_i32, %c0_i32_0 : i32, i32
  }
  func.func @transform_4(%arg0: i32, %arg1: i32) -> (i32, i32, i32) {
    %c0_i32 = arith.constant 0 : i32
    %c0_i32_0 = arith.constant 0 : i32
    %c0_i32_1 = arith.constant 0 : i32
    %c0_i32_2 = arith.constant 0 : i32
    return %c0_i32, %c0_i32_0, %c0_i32_1 : i32, i32, i32
  }
  func.func @transform_5(%arg0: i32, %arg1: i32) -> (i32, i32) {
    %c0_i32 = arith.constant 0 : i32
    %c0_i32_0 = arith.constant 0 : i32
    %c0_i32_1 = arith.constant 0 : i32
    return %c0_i32, %c0_i32_0 : i32, i32
  }
  func.func @transform_6(%arg0: i32, %arg1: i32) -> (i32, i32, i32) {
    %c0_i32 = arith.constant 0 : i32
    %c0_i32_0 = arith.constant 0 : i32
    %c0_i32_1 = arith.constant 0 : i32
    %c0_i32_2 = arith.constant 0 : i32
    return %c0_i32, %c0_i32_0, %c0_i32_1 : i32, i32, i32
  }
  func.func @transform_7(%arg0: i32, %arg1: i32) -> (i32, i32, i32) {
    %c0_i32 = arith.constant 0 : i32
    %c0_i32_0 = arith.constant 0 : i32
    %c0_i32_1 = arith.constant 0 : i32
    %c0_i32_2 = arith.constant 0 : i32
    return %c0_i32, %c0_i32_0, %c0_i32_1 : i32, i32, i32
  }
  func.func @transform_8(%arg0: i32, %arg1: i32) -> (i32, i32) {
    %c0_i32 = arith.constant 0 : i32
    %c0_i32_0 = arith.constant 0 : i32
    %c0_i32_1 = arith.constant 0 : i32
    return %c0_i32, %c0_i32_0 : i32, i32
  }
  func.func @transform_9(%arg0: i32, %arg1: i32) -> (i32, i32) {
    %c0_i32 = arith.constant 0 : i32
    %c0_i32_0 = arith.constant 0 : i32
    %c0_i32_1 = arith.constant 0 : i32
    return %c0_i32, %c0_i32_0 : i32, i32
  }
  func.func @transform_10(%arg0: i32, %arg1: i32) -> (i32, i32, i32) {
    %c0_i32 = arith.constant 0 : i32
    %c0_i32_0 = arith.constant 0 : i32
    return %arg0, %c0_i32, %arg1 : i32, i32, i32
  }
}

</mosaic_0001>

<bundles_post_ra>
// kernel: tpu_custom_call.1
= control target key start
LH: loop header
LB: loop body
LE: loop exit
PB: predicated region body
PF: predicated region fallthrough
CT: control target
= control target key end

     0   :  { %s1760_s0 = inlined_call_operand.vmem [shape: bf16[2,16,256], index: 0, kind: input, shape index: {}]   ;;  %s1761_s1 = inlined_call_operand.vmem [shape: bf16[2,16,16], index: 1, kind: input, shape index: {}]   ;;  %s1762_s2 = inlined_call_operand.vmem [shape: bf16[8,16], index: 2, kind: input, shape index: {}]   ;;  %s1763_s3 = inlined_call_operand.vmem [shape: bf16[16,16], index: 3, kind: input, shape index: {}]   ;;  %s1764_s4 = inlined_call_operand.vmem [shape: bf16[2,8,8], index: 4, kind: input, shape index: {}]   ;;  %s1765_s5 = inlined_call_operand.vmem [shape: bf16[16,8], index: 5, kind: input, shape index: {}]   ;;  %s1766_s6 = inlined_call_operand.vmem [shape: bf16[2,16,16], index: 6, kind: input, shape index: {}]   ;;  %s1767_s7 = inlined_call_operand.vmem [shape: f32[5,8,1], index: 7, kind: input, shape index: {}]   ;;  %s1768_s8 = inlined_call_operand.vmem [shape: f32[16,1], index: 8, kind: input, shape index: {}]   ;;  %s1769_s9 = inlined_call_operand.vmem [shape: f32[16,1], index: 9, kind: input, shape index: {}]   ;;  %s1770_s10 = inlined_call_operand.hbm [shape: f32[2,16,256], index: 10, kind: output, shape index: {}]  }
   0x1   :  { %1775 = sst [smem:[#allocation12_spill]] %s1760_s0 }
   0x2   :  { %15 = vsyncpa [#allocation6], 0 }
   0x3   :  { %17 = vsyncpa [#allocation6 + $0x1], 0  ;;  %s1510_s13 = smov 0   ;;  %s1512_s14 = smov 0  }
   0x4   :  { %s1514_s15 = smov 0   ;;  %s1516_s16 = smov 0  }
   0x5   :  { %s1518_s17 = smov 0   ;;  %s1520_s18 = smov 0  }
   0x6   :  { %s1522_s19 = smov 0   ;;  %s1524_s20 = smov 0  }
   0x7 LB: > { %1776 = sst [smem:[#allocation8_spill]] %s1415_s13  ;;  %s1140_s21 = sadd.s32 4294967295, %s1443_s20   ;;  %s1443_s20 = sphi %s1524_s20, %s23_s20   ;;  %s1439_s19 = sphi %s1522_s19, %s1794_s19   ;;  %s1435_s18 = sphi %s1520_s18, %s1793_s18   ;;  %s1431_s17 = sphi %s1518_s17, %s1792_s17   ;;  %s1427_s16 = sphi %s1516_s16, %s1791_s16   ;;  %s1423_s15 = sphi %s1514_s15, %s1790_s15   ;;  %s1419_s14 = sphi %s1512_s14, %s1789_s14   ;;  %s1415_s13 = sphi %s1510_s13, %s1788_s13  }
   0x8   : > { %s1141_s22 = sadd.s32 4294967294, %s1443_s20   ;;  %s32_s23 = sadd.s32 1, %s1435_s18 }
   0x9   : > { %p33_p0 = scmp.ge.s32.totalorder %s32_s23, 2  ;;  %s35_s24 = sadd.s32 1, %s1439_s19 }
   0xa   : > { %p51_p1 = scmp.ne.s32.totalorder %s1423_s15, %s1419_s14  ;;  %p52_p2 = scmp.eq.s32.totalorder %s1443_s20, 0 }
   0xb   : > { %s1796_s23 = smov (%p33_p0, %s32_s23), 0  ;;  %s1798_s24 = smov (!%p33_p0, %s35_s24), %s1439_s19 }
   0xc   : > { %1777 = sst [smem:[#allocation9_spill]] %s1796_s23  ;;  %s40_s25 = ssub.s32 %s1435_s18, %s1796_s23 }
   0xd   : > { %p1562_p3 = por %p52_p2, %p51_p1  ;;  %p37_p4 = scmp.ge.s32.totalorder %s1798_s24, 2 }
   0xe   : > { %p277_p5 = scmp.eq.s32.totalorder %s1140_s21, 3  ;;  %p282_p6 = scmp.ne.s32.totalorder %s1419_s14, %s1415_s13 }
   0xf   : > { %p283_p7 = scmp.eq.s32.totalorder %s1141_s22, 3  ;;  %s1800_s24 = smov (%p37_p4, %s1798_s24), 0 }
  0x10   : > { %1779 = sst [smem:[#allocation10_spill]] %s1800_s24  ;;  %p1570_p8 = por %p277_p5, %p51_p1 }
  0x11   : > { %p1574_p9 = por %p283_p7, %p282_p6  ;;  %s39_s29 = ssub.s32 %s1439_s19, %s1800_s24 }
  0x12   : > { %s41_s30 = sor.u32 %s40_s25, %s39_s29  ;;  %s44_s11 = sadd.s32 1, %s1423_s15 }
  0x13   : > { %s1781_s28 = scalar_select %p1574_p9, 1, 0 }
  0x14   : > { %p42_p10 = scmp.eq.s32.totalorder %s41_s30, 0  ;;  %p1143_p11 = scmp.ge.s32.totalorder %s1443_s20, 4 }
  0x15   : > { %1782 = sst [smem:[#allocation11_spill]] %s1781_s28 }
  0x16   : > { %s1582_s12 = scalar_select %p42_p10, %s1423_s15, %s44_s11  }
  0x17   : > { %323 = sbr.rel (%p1143_p11) target bundleno = 41 (0x29), region = 48 }
  0x1e   : > { %326 = sbr.rel (!%p1562_p3) target bundleno = 41 (0x29), region = 52  ;;  %s328_s21 = sand.u32 (%p1562_p3), 1, %s1423_s15  }
  0x1f   : > { %s1145_s22 = sshll.u32 (%p1562_p3), %s1439_s19, 2  ;;  %s1144_s23 = sshll.u32 (%p1562_p3), %s328_s21, 3 }
  0x20   : > { %s332_s13 = sadd.s32 (%p1562_p3), %s1435_s18, %s1145_s22  ;;  %s1783_s0 = sld [smem:[#allocation12_spill]] (%p1562_p3) }
  0x21   : > { %s1146_s28 = sshll.u32 (%p1562_p3), %s332_s13, 2  ;;  %s330_s30 = scalar_lea.vmem (%p1562_p3), [#allocation4], %s1144_s23 }
  0x26   : > { %s334_s29 = scalar_lea.vmem %s1783_s0, %s1146_s28 }
  0x27   : > { %v350_v0 = vld [vmem:[%s334_s29] sm:$0xf]  ;;  %v352_v1 = vld [vmem:[%s334_s29 + $0x8] sm:$0xf] }
  0x28   : > { %351 = vst [vmem:[%s330_s30] sm:$0xf] %v350_v0  ;;  %353 = vst [vmem:[%s330_s30 + $0x4] sm:$0xf] %v352_v1 }
  0x29 PF: > { %p1147_p12 = scmp.ge.s32.totalorder %s1443_s20, 1  ;;  %p387_p13 = scmp.lt.s32.totalorder %s1443_s20, 5 }
  0x2b   : > { %p388_p0 = pnand %p1147_p12, %p387_p13 }
  0x2c   : > { %s1596_s13 = sand.u32 (!%p388_p0), 1, %s1419_s14   ;;  %p436_p1 = scmp.lt.s32.totalorder (!%p388_p0), %s1431_s17, 1 }
  0x2d   : > { %391 = sbr.rel (%p388_p0) target bundleno = 1903 (0x76f), region = 97  ;;  %s1148_s24 = sshll.u32 (!%p388_p0), %s1596_s13, 3 }
  0x2e   : > { %s1149_s23 = sshll.u32 (!%p388_p0), %s1596_s13, 4  ;;  %s1605_s25 = scalar_lea.vmem (!%p388_p0), [#allocation4], %s1148_s24 }
  0x2f   : > { %s1607_s29 = scalar_lea.vmem (!%p388_p0), [#allocation5], %s1149_s23  ;;  %p1152_p2 = scmp.ne.s32.totalorder (!%p388_p0), %s1427_s16, 0 }
  0x34   : > { %s437_s26 = scalar_select %p436_p1, %s1431_s17, 1 }
  0x35   : > { %445 = sbr.rel (%p1152_p2) target bundleno = 501 (0x1f5), region = 105  ;;  %v1445_v3 = vmov (!%p1152_p2), 0.0   ;;  %v1336_v4 = vld [vmem:[%s1763_s3] sm:$0xff] (!%p1152_p2)   ;;  %vm1446_vm0 = vmmov (!%p1152_p2), 0   ;;  %vm461_vm1 = vcmask (!%p1152_p2), 130048   ;;  %v1156_v5 = vld [vmem:[%s1767_s7 + $0x10] sm:$0xff] (!%p1152_p2) }
  0x36   : > { %s1180_s28 = sshll.u32 %s437_s26, 3  ;;  %1199 = vmatprep.subr.bf16.mxu0 (!%p1152_p2), %v1445_v3  ;;  %1205 = vmatprep.subr.bf16.mxu1 (!%p1152_p2), %v1445_v3  ;;  %v1447_v6 = vmov (!%p1152_p2), 0   ;;  %v1157_v7 = vld [vmem:[%s1767_s7 + $0x20] sm:$0xff] (!%p1152_p2)  ;;  %v1159_v8 = vld [vmem:[%s1767_s7 + $0x18] sm:$0xff] (!%p1152_p2)  ;;  %vm538_vm2 = vcmask (!%p1152_p2), 1043456   ;;  %vm584_vm3 = vcmask (!%p1152_p2), 125952  }
  0x37   : > { %s440_s22 = scalar_lea.vmem %s1761_s1, %s1180_s28  ;;  %1201 = vmatprep.mubr.msk.bf16.mxu0 (!%p1152_p2), %vm1446_vm0, %v1445_v3  ;;  %1333 = vset.pattern.permute.xlu0 (!%p1152_p2), %v1447_v6  ;;  %v1158_v22 = vld [vmem:[%s1764_s4 + $0x4] sm:$0xf] (!%p1152_p2)  ;;  %vm534_vm4 = vcmask (!%p1152_p2), 64512  }
  0x38   : > { %v1335_v2 = vld [vmem:[%s440_s22] sm:$0xff] (!%p1152_p2)   ;;  %1207 = vmatprep.mubr.msk.bf16.mxu1 (!%p1152_p2), %vm1446_vm0, %v1445_v3  ;;  %510 = vperm.xlu0 (!%p1152_p2), %1333, %v1156_v5  }
  0x39   : > { %1200 = vmatpush3.bf16.msra.mxu0 (!%p1152_p2), %v1335_v2  ;;  %1334 = vset.pattern.permute.xlu1 (!%p1152_p2), %v1447_v6 }
  0x3a   : > { %531 = vperm.xlu1 (!%p1152_p2), %1334, %v1159_v8  }
  0x3c   : > { %1202 = vmatmul.mubr.msk.bf16.vlgmr.msra.gmra.mrb[0].mxu0 %vm461_vm1, %v1336_v4  ;;  %519 = vperm.xlu0 %1333, %v1157_v7  }
  0xb7   : > { %v511_v9 = vpop.permute.xlu0 %510 }
  0xb9   : > { %v532_v23 = vpop.permute.xlu1 %531 }
  0xbb   : > { %v520_v13 = vpop.permute.xlu0 %519 }
 0x10f   : > { %v499_v10 = vpop.f32.mrb[0].mxu0 }
 0x110   : > { %v513_v11 = vadd.f32 %v511_v9, %v499_v10  ;;  %v1203_v12 = vpop.f32.mrb[1].mxu0 }
 0x111   : > { %v502_v14 = vpop.f32.mrb[2].mxu0 }
 0x112   : > { %v514_v15 = vmax.f32 %v513_v11, 0.0  ;;  %v522_v16 = vadd.f32 %v520_v13, %v502_v14  ;;  %v1204_v17 = vpop.f32.mrb[3].mxu0 }
 0x114   : > { %v526_v18 = vpack.c.bf16 %v514_v15, %v514_v15  ;;  %v523_v19 = vmax.f32 %v522_v16, 0.0 }
 0x116   : > { %v586_v20 = vpack.c.bf16 %v523_v19, %v523_v19  ;;  %v540_v21 = vsel %vm538_vm2, %v526_v18, 0 }
 0x117   : > { %1206 = vmatpush3.bf16.msra.mxu1 %v540_v21 }
 0x118   : > { %587 = vst.msk [vmem:[#allocation3] sm:$0xf] %vm584_vm3, %v586_v20 }
 0x11a   : > { %1208 = vmatmul.mubr.msk.bf16.vlgmr.msra.gmra.mrb[0].mxu1 %vm534_vm4, %v1158_v22 }
 0x1ed   : > { %v576_v24 = vpop.f32.mrb[0].mxu1 }
 0x1ee   : > { %v577_v25 = vadd.f32 %v576_v24, %v532_v23  ;;  %v1209_v26 = vpop.f32.mrb[1].mxu1 }
 0x1ef   : > { %v579_v27 = vpop.f32.mrb[2].mxu1 }
 0x1f0   : > { %v582_v28 = vmax.f32 %v577_v25, 0.0  ;;  %v1210_v29 = vpop.f32.mrb[3].mxu1 }
 0x1f2   : > { %v583_v30 = vpack.c.bf16 %v582_v28, %v582_v28 }
 0x1f4   : > { %585 = vst.msk [vmem:[#allocation2] sm:$0xf] %vm584_vm3, %v583_v30 }
 0x1f5 PF: > { %v1628_v31 = vld [vmem:[%s1605_s25] sm:$0xff]   ;;  %v1448_v32 = vmov 0.0   ;;  %v591_v33 = vld [vmem:[%s1767_s7] sm:$0xff]  ;;  %vm1449_vm5 = vmmov 0   ;;  %vm603_vm6 = vcmask 130048   ;;  %v1450_v35 = vmov 0  }
 0x1f6   : > { %1211 = vmatprep.subr.bf16.mxu0 %v1448_v32  ;;  %1217 = vmatprep.subr.bf16.mxu1 %v1448_v32  ;;  %v590_v34 = vld [vmem:[%s1762_s2] sm:$0xf]  ;;  %v1163_v36 = vld [vmem:[%s1767_s7 + $0x8] sm:$0xff]  ;;  %vm661_vm7 = vcmask 1043456   ;;  %vm657_vm8 = vcmask 64512   ;;  %s1176_s24 = sshll.u32 %s1431_s17, 2 }
 0x1f7   : > { %1212 = vmatpush3.bf16.msra.mxu0 %v1628_v31  ;;  %1213 = vmatprep.mubr.msk.bf16.mxu0 %vm1449_vm5, %v1448_v32  ;;  %v843_v37 = vld [vmem:[%s1768_s8 + $0x8] sm:$0xff]  ;;  %v648_v49 = vld [vmem:[%s1764_s4] sm:$0xf]  ;;  %v794_v24 = vld [vmem:[#allocation3] sm:$0xf]  ;;  %s1042_s23 = sadd.s32 %s1427_s16, %s1176_s24  ;;  %s1045_s28 = sshll.u32 %s1607_s29, 4  ;;  %s1704_s28 = int_to_ptr.vmem [resolvable:$true] %s1045_s28 }
 0x1f8   : > { %1337 = vset.pattern.permute.xlu0 %v1450_v35  ;;  %1219 = vmatprep.mubr.msk.bf16.mxu1 %vm1449_vm5, %v1448_v32  ;;  %v1013_v38 = vld [vmem:[%s1769_s9 + $0x8] sm:$0xff]  ;;  %v842_v25 = vld [vmem:[%s1768_s8] sm:$0xff]  ;;  %s1177_s25 = sshll.u32 %s1042_s23, 7  ;;  %s1031_s11 = scalar_lea.sflag [#allocation6], %s1596_s13 }
 0x1f9   : > { %594 = vperm.xlu0 %1337, %v591_v33   ;;  %1223 = vmatprep.subr.bf16.mxu0 %v1448_v32  ;;  %v1012_v26 = vld [vmem:[%s1769_s9] sm:$0xff]  ;;  %s1702_s16 = scalar_lea.hbm %s1770_s10, %s1177_s25  ;;  %s1349_s21 = scalar_lea.vmem %s1704_s28, 256 }
 0x1fa   : > { %1214 = vmatmul.mubr.msk.bf16.vlgmr.msra.gmra.mrb[0].mxu0 %vm603_vm6, %v590_v34  ;;  %v1340_v34 = vld [vmem:[%s1765_s5] sm:$0xff]   ;;  %p1350_p3 = scmp.ne.s32.totalorder %s1704_s28, %s1349_s21  ;;  %s1451_s22 = smov [#allocation5]  }
 0x1fb   : > { %1225 = vmatprep.mubr.msk.bf16.mxu0 %vm1449_vm5, %v1448_v32  ;;  %v707_v39 = vld [vmem:[#allocation2] sm:$0xf]  ;;  %s1353_s30 = sshll.u32 %s1451_s22, 4  ;;  %s1354_s30 = int_to_ptr.vmem [resolvable:$false] %s1353_s30 }
 0x1fc   : > { %708 = vxpose.xlu1.c.b16.start.end [1/1] (short) (narrow) %v707_v39, 16  ;;  %p1351_p4 = pnand %p1350_p3, %p1570_p8  ;;  %s1355_s26 = scalar_lea.vmem %s1354_s30, 512 }
 0x1fd   : > { %654 = vperm.xlu0 %1337, %v1163_v36   ;;  %p1356_p6 = scmp.lt.s32.totalorder %s1704_s28, %s1354_s30  ;;  %p1357_p7 = scmp.lt.s32.totalorder %s1355_s26, %s1349_s21 }
 0x1fe   : > { %p1352_p5 = pneg %p1351_p4 }
 0x1ff   : > { %p1358_p10 = por %p1357_p7, %p1356_p6 }
 0x200   : > { %1338 = vset.pattern.permute.xlu1 %v1450_v35  ;;  %v1341_v35 = vld [vmem:[%s1766_s6 + $0x8] sm:$0xff]  }
 0x201   : > { %851 = vperm.xlu0 %1337, %v843_v37   ;;  %846 = vperm.xlu1 %1338, %v842_v25   ;;  %p1359_p11 = pnand %p1358_p10, %p1352_p5 }
 0x205   : > { %1021 = vperm.xlu0 %1337, %v1013_v38   ;;  %1016 = vperm.xlu1 %1338, %v1012_v26  }
 0x262   : > { %v716_v59 = vpop.trf.xlu1 }
 0x278   : > { %v595_v40 = vpop.permute.xlu0 %594 }
 0x27c   : > { %v655_v50 = vpop.permute.xlu0 %654 }
 0x280   : > { %v847_v36 = vpop.permute.xlu1 %846 }
 0x2cd   : > { %v641_v41 = vpop.f32.mrb[0].mxu0 }
 0x2ce   : > { %v642_v42 = vadd.f32 %v641_v41, %v595_v40  ;;  %v1215_v43 = vpop.f32.mrb[1].mxu0  ;;  %v852_v40 = vpop.permute.xlu0 %851 }
 0x2cf   : > { %v644_v44 = vpop.f32.mrb[2].mxu0 }
 0x2d0   : > { %v647_v45 = vmax.f32 %v642_v42, 0.0  ;;  %v1216_v46 = vpop.f32.mrb[3].mxu0 }
 0x2d2   : > { %v649_v47 = vpack.c.bf16 %v647_v45, %v647_v45 }
 0x2d4   : > { %v663_v48 = vsel %vm661_vm7, %v649_v47, 0 }
 0x2d5   : > { %1218 = vmatpush3.bf16.msra.mxu1 %v663_v48 }
 0x2d6   : > { %1229 = vmatprep.subr.bf16.mxu1 %v1448_v32 }
 0x2d8   : > { %1220 = vmatmul.mubr.msk.bf16.vlgmr.msra.gmra.mrb[0].mxu1 %vm657_vm8, %v648_v49 }
 0x2d9   : > { %1231 = vmatprep.mubr.msk.bf16.mxu1 %vm1449_vm5, %v1448_v32 }
 0x3ab   : > { %v699_v51 = vpop.f32.mrb[0].mxu1 }
 0x3ac   : > { %v700_v52 = vadd.f32 %v699_v51, %v655_v50  ;;  %v1221_v53 = vpop.f32.mrb[1].mxu1 }
 0x3ad   : > { %v702_v54 = vpop.f32.mrb[2].mxu1 }
 0x3ae   : > { %v705_v55 = vmax.f32 %v700_v52, 0.0  ;;  %v1222_v56 = vpop.f32.mrb[3].mxu1  ;;  %v1017_v54 = vpop.permute.xlu1 %1016 }
 0x3b0   : > { %v706_v57 = vpack.c.bf16 %v705_v55, %v705_v55 }
 0x3b2   : > { %v728_v58 = vsel %vm661_vm7, %v706_v57, 0 }
 0x3b3   : > { %1224 = vmatpush3.bf16.msra.mxu0 %v728_v58 }
 0x3b4   : > { %1235 = vmatprep.subr.bf16.mxu0 %v1448_v32 }
 0x3b6   : > { %1226 = vmatmul.mubr.msk.bf16.vlgmr.msra.gmra.mrb[4].mxu0 %vm657_vm8, %v716_v59  ;;  %v1022_v59 = vpop.permute.xlu0 %1021 }
 0x3b7   : > { %1237 = vmatprep.mubr.msk.bf16.mxu0 %vm1449_vm5, %v1448_v32 }
 0x489   : > { %v764_v60 = vpop.f32.mrb[4].mxu0 }
 0x48a   : > { %v1227_v61 = vpop.f32.mrb[5].mxu0 }
 0x48b   : > { %v767_v62 = vpop.f32.mrb[6].mxu0 }
 0x48c   : > { %v771_v63 = vmax.f32 %v764_v60, %v767_v62  ;;  %v1228_v0 = vpop.f32.mrb[7].mxu0 }
 0x48e   : > { %v772_v1 = vrot.slane %v771_v63, 4 }
 0x490   : > { %v773_v2 = vmax.f32 %v771_v63, %v772_v1 }
 0x492   : > { %v774_v3 = vrot.slane %v773_v2, 2 }
 0x494   : > { %v775_v4 = vmax.f32 %v773_v2, %v774_v3 }
 0x496   : > { %v776_v5 = vrot.slane %v775_v4, 1 }
 0x498   : > { %v777_v6 = vmax.f32 %v775_v4, %v776_v5 }
 0x49a   : > { %v778_v7 = vsub.f32 %v764_v60, %v777_v6  ;;  %v779_v8 = vsub.f32 %v767_v62, %v777_v6 }
 0x49c   : > { %v780_v9 = vmul.f32 1.442695, %v778_v7  ;;  %v782_v10 = vmul.f32 1.442695, %v779_v8 }
 0x49e   : > { %1343 = vpow2.f32 %v780_v9 }
 0x49f   : > { %1345 = vpow2.f32 %v782_v10 }
 0x4a8   : > { %v1344_v11 = vpop.eup %1343 }
 0x4a9   : > { %v1346_v12 = vpop.eup %1345 }
 0x4aa   : > { %v784_v13 = vadd.f32 %v1346_v12, %v1344_v11 }
 0x4ac   : > { %v785_v14 = vrot.slane %v784_v13, 4 }
 0x4ae   : > { %v786_v15 = vadd.f32 %v785_v14, %v784_v13 }
 0x4b0   : > { %v787_v16 = vrot.slane %v786_v15, 2 }
 0x4b2   : > { %v788_v17 = vadd.f32 %v787_v16, %v786_v15 }
 0x4b4   : > { %v789_v18 = vrot.slane %v788_v17, 1 }
 0x4b6   : > { %v790_v19 = vadd.f32 %v789_v18, %v788_v17 }
 0x4b8   : > { %1347 = vrcp.f32 %v790_v19 }
 0x4c2   : > { %v1348_v20 = vpop.eup %1347 }
 0x4c3   : > { %v792_v21 = vmul.f32 %v1348_v20, %v1344_v11  ;;  %v793_v22 = vmul.f32 %v1348_v20, %v1346_v12 }
 0x4c5   : > { %v795_v23 = vpack.c.bf16 %v793_v22, %v792_v21 }
 0x4c7   : > { %1230 = vmatpush3.bf16.msra.mxu1 %v795_v23 }
 0x4c8   : > { %1241 = vmatprep.subr.bf16.mxu1 %v1448_v32 }
 0x4ca   : > { %1232 = vmatmul.mubr.msk.bf16.vlgmr.msra.gmra.mrb[4].mxu1 %vm603_vm6, %v794_v24 }
 0x4cb   : > { %1242 = vmatpush3.bf16.msra.mxu1 %v1628_v31  ;;  %1243 = vmatprep.mubr.msk.bf16.mxu1 %vm1449_vm5, %v1448_v32 }
 0x4d2   : > { %1244 = vmatmul.mubr.msk.bf16.vlgmr.msra.gmra.mrb[8].mxu1 %vm603_vm6, %v1341_v35 }
 0x59d   : > { %v833_v27 = vpop.f32.mrb[4].mxu1 }
 0x59e   : > { %v841_v28 = vpack.c.bf16 %v833_v27, %v833_v27  ;;  %v1233_v29 = vpop.f32.mrb[5].mxu1 }
 0x59f   : > { %v836_v30 = vpop.f32.mrb[6].mxu1 }
 0x5a0   : > { %v863_v33 = vsel %vm661_vm7, %v841_v28, 0  ;;  %v1234_v31 = vpop.f32.mrb[7].mxu1 }
 0x5a1   : > { %1236 = vmatpush3.bf16.msra.mxu0 %v863_v33 }
 0x5a2   : > { %1247 = vmatprep.subr.bf16.mxu0 %v1448_v32 }
 0x5a4   : > { %1238 = vmatmul.mubr.msk.bf16.vlgmr.msra.gmra.mrb[8].mxu0 %vm657_vm8, %v1340_v34 }
 0x5a5   : > { %1249 = vmatprep.mubr.msk.bf16.mxu0 %vm1449_vm5, %v1448_v32  ;;  %v1342_v32 = vld [vmem:[%s1766_s6] sm:$0xff]   ;;  %v956_v47 = vpop.f32.mrb[8].mxu1 }
 0x5a6   : > { %v1245_v48 = vpop.f32.mrb[9].mxu1 }
 0x5a7   : > { %v959_v49 = vpop.f32.mrb[10].mxu1 }
 0x5a8   : > { %v1246_v50 = vpop.f32.mrb[11].mxu1 }
 0x677   : > { %v899_v37 = vpop.f32.mrb[8].mxu0 }
 0x678   : > { %v900_v38 = vadd.f32 %v899_v37, %v847_v36  ;;  %v1239_v39 = vpop.f32.mrb[9].mxu0 }
 0x679   : > { %v902_v41 = vpop.f32.mrb[10].mxu0 }
 0x67a   : > { %v903_v42 = vadd.f32 %v902_v41, %v852_v40  ;;  %v1240_v43 = vpop.f32.mrb[11].mxu0  ;;  %v906_v44 = vmax.f32 %v900_v38, 0.0 }
 0x67c   : > { %v907_v45 = vmax.f32 %v903_v42, 0.0 }
 0x67e   : > { %v910_v46 = vpack.c.bf16 %v907_v45, %v906_v44 }
 0x680   : > { %1248 = vmatpush3.bf16.msra.mxu0 %v910_v46 }
 0x683   : > { %1250 = vmatmul.mubr.msk.bf16.vlgmr.msra.gmra.mrb[12].mxu0 %vm603_vm6, %v1342_v32 }
 0x756   : > { %v1005_v51 = vpop.f32.mrb[12].mxu0 }
 0x757   : > { %v1006_v52 = vadd.f32 %v1005_v51, %v956_v47  ;;  %v1251_v53 = vpop.f32.mrb[13].mxu0 }
 0x758   : > { %v1008_v55 = vpop.f32.mrb[14].mxu0 }
 0x759   : > { %v1024_v56 = vadd.f32 %v1017_v54, %v1006_v52  ;;  %v1009_v57 = vadd.f32 %v1008_v55, %v959_v49  ;;  %v1252_v58 = vpop.f32.mrb[15].mxu0 }
 0x75b   : > { %v1026_v60 = vmax.f32 %v1024_v56, 0.0  ;;  %v1025_v61 = vadd.f32 %v1022_v59, %v1009_v57 }
 0x75d   : > { %1028 = vst [vmem:[%s1607_s29] sm:$0xff] %v1026_v60  ;;  %v1027_v62 = vmax.f32 %v1025_v61, 0.0 }
 0x75f   : > { %1029 = vst [vmem:[%s1607_s29 + $0x8] sm:$0xff] %v1027_v62 }
 0x760   : > { %1362 = shalt.err (!%p1359_p11)
}
 0x761   : > { %s1363_s29 = scalar_lea.hbm %s1702_s16, 256  ;;  %s1367_s25 = scalar_lea.hbm %s1770_s10, 1024 }
 0x762   : > { %p1364_p12 = scmp.ne.s32.totalorder %s1702_s16, %s1363_s29  ;;  %p1368_p1 = scmp.lt.u32.totalorder %s1702_s16, %s1770_s10 }
 0x763   : > { %p1369_p2 = scmp.lt.u32.totalorder %s1367_s25, %s1363_s29  ;;  %p1371_p4 = scmp.lt.u32.totalorder %s1363_s29, %s1702_s16 }
 0x764   : > { %p1365_p13 = pnand %p1364_p12, %p1570_p8 }
 0x765   : > { %p1370_p3 = por %p1369_p2, %p1368_p1 }
 0x766   : > { %p1366_p0 = pneg %p1365_p13 }
 0x767   : > { %p1372_p5 = por %p1371_p4, %p1370_p3 }
 0x769   : > { %p1373_p6 = pnand %p1372_p5, %p1366_p0 }
 0x76b   : > { %1376 = shalt.err (!%p1373_p6)
}
 0x76c   : > { %s1452_s21 = smov 128   ;;  %s1453_s22 = smov 256  }
 0x76d   : > { %s1454_s30 = smov 8  }
 0x76e   : > { %1253 = dma.vmem_to_hbm [thread:$0]  (%p1570_p8), %s1704_s28, 256, %s1702_s16, %s1031_s11, %s1452_s21, %s1453_s22, %s1454_s30  }
 0x76f PF: > { %s1784_s26 = sld [smem:[#allocation8_spill]]  ;;  %p1259_p7 = scmp.ge.s32.totalorder %s1443_s20, 2 }
 0x771   : > { %p1256_p10 = pnand %p1259_p7, %p1574_p9 }
 0x775   : > { %s1060_s23 = sand.u32 1, %s1784_s26  }
 0x776   : > { %s1061_s29 = scalar_lea.sflag [#allocation6], %s1060_s23 }
 0x777   : > { %1410 = dma.done.wait (!%p1256_p10), %s1061_s29, 256  }
 0x778   : > { %1412 = vsyncadd (!%p1256_p10), %s1061_s29, 4294967040  ;;  %s23_s20 = sadd.s32 1, %s1443_s20   ;;  %s1786_s27 = sld [smem:[#allocation9_spill]] }
 0x779   : > { %p20_p11 = scmp.ge.s32.totalorder %s23_s20, 6   ;;  %s1787_s28 = sld [smem:[#allocation10_spill]] }
 0x77a   : > { %s1788_s13 = smov %s1419_s14  ;;  %s1789_s14 = smov %s1423_s15 }
 0x77b   : > { %s1790_s15 = smov %s1582_s12  ;;  %s1791_s16 = smov %s1435_s18 }
 0x77c   : > { %s1792_s17 = smov %s1439_s19  ;;  %22 = sbr.rel (!%p20_p11) target bundleno = 7 (0x7), region = 154 }
 0x77e   : > { %s1793_s18 = smov %s1786_s27 }
 0x77f   : > { %s1794_s19 = smov %s1787_s28 }
 0x783   :  { %1066 = vsyncpa [#allocation6], 1 }
 0x784   :  { %1068 = vsyncpa [#allocation6 + $0x1], 1 }

</bundles_post_ra>
